<compile_context>
chip_gen: v6e
topology: v6e:2x2x1
jax: 0.10.0
libtpu: 0.0.40
codegen_flags: <defaults>
</compile_context>

<pallas_src>
import jax
import jax.numpy as jnp
from jax.experimental import pallas as pl
from jax.experimental.pallas import tpu as pltpu


F_IN = 102                 # input features (streamed unpadded; Mosaic masks the partial K tile)
H1, H2, N_OUT = 64, 32, 2
TB_MAX = 512               # batch-tile cap (multiple of 8); keeps VMEM tiny, gives >=2 tiles


def _round_up(n, m):
    return ((n + m - 1) // m) * m


def adult_mlp_kernel(x_ref, w1_ref, b1_ref, w2_ref, b2_ref, w3d_ref, b3d_ref, o_ref):
    # ---- Layer 1: (TB, 102) @ (102, 64); K=102 is a partial lane tile, Mosaic masks it.
    x = x_ref[...].astype(w1_ref.dtype)
    h1 = jnp.dot(x, w1_ref[...], preferred_element_type=jnp.float32)
    h1 = jnp.maximum(h1 + b1_ref[...], 0.0)

    # ---- Layer 2: (TB, 64) @ (64, 32)
    h2 = jnp.dot(h1.astype(w2_ref.dtype), w2_ref[...], preferred_element_type=jnp.float32)
    h2 = jnp.maximum(h2 + b2_ref[...], 0.0)

    # ---- Layer 3 + softmax, folded to a single logit difference:
    #   d  = h2 . (w3[:,1]-w3[:,0]) + (b3[1]-b3[0])
    #   p1 = sigmoid(d),   softmax(out) == [1-p1, p1]   (exact, rows sum to 1)
    # This avoids the (TB,2) lane-sparse max/exp/sum/reciprocal epilogue entirely.
    d = jnp.sum(h2 * w3d_ref[...], axis=-1, keepdims=True) + b3d_ref[...]   # (TB, 1) f32
    p1 = 1.0 / (1.0 + jnp.exp(-d))                                          # exp -> EUP

    p1b = jnp.broadcast_to(p1, (p1.shape[0], N_OUT))
    col = jax.lax.broadcasted_iota(jnp.int32, p1b.shape, 1)
    o_ref[...] = jnp.where(col == 1, p1b, 1.0 - p1b).astype(o_ref.dtype)


def prepare_params(params, compute_dtype=jnp.bfloat16):
    """One-time weight prep (hoisted out of the forward): dtype casts + w3/b3 fold.

    params: (w1 (102,64), b1 (1,64), w2 (64,32), b2 (1,32), w3 (32,2), b3 (1,2))
    """
    w1, b1, w2, b2, w3, b3 = params
    w1c = w1.astype(compute_dtype)                                   # (102, 64)
    w2c = w2.astype(compute_dtype)                                   # (64, 32)
    b1f = b1.astype(jnp.float32).reshape(1, H1)
    b2f = b2.astype(jnp.float32).reshape(1, H2)
    w3d = (w3[:, 1] - w3[:, 0]).astype(jnp.float32).reshape(1, H2)   # (1, 32)
    b3d = (b3.reshape(-1)[1] - b3.reshape(-1)[0]).astype(jnp.float32).reshape(1, 1)
    return (w1c, b1f, w2c, b2f, w3d, b3d)


def adult_model_forward(x, prepared):
    """x: (B, 102); prepared: output of prepare_params. Returns (B, 2) f32 probabilities."""
    w1c, b1f, w2c, b2f, w3d, b3d = prepared
    B = x.shape[0]

    # Tile so the grid has several tiles (v7x has 2 TensorCores); ragged last block is masked.
    tb = min(TB_MAX, _round_up(max(pl.cdiv(B, 4), 1), 8))
    grid = (pl.cdiv(B, tb),)

    in_specs = [
        pl.BlockSpec((tb, F_IN), lambda i: (i, 0)),    # x: streamed, double-buffered
        pl.BlockSpec((F_IN, H1), lambda i: (0, 0)),    # weights/biases: VMEM-resident
        pl.BlockSpec((1, H1), lambda i: (0, 0)),
        pl.BlockSpec((H1, H2), lambda i: (0, 0)),
        pl.BlockSpec((1, H2), lambda i: (0, 0)),
        pl.BlockSpec((1, H2), lambda i: (0, 0)),
        pl.BlockSpec((1, 1), lambda i: (0, 0)),
    ]
    out_spec = pl.BlockSpec((tb, N_OUT), lambda i: (i, 0))

    itemsize_x = jnp.dtype(x.dtype).itemsize
    itemsize_w = jnp.dtype(w1c.dtype).itemsize
    cost = pl.CostEstimate(
        flops=2 * B * (F_IN * H1 + H1 * H2 + H2),
        transcendentals=B,                                            # one exp per row
        bytes_accessed=B * (F_IN * itemsize_x + N_OUT * 4)
                       + (F_IN * H1 + H1 * H2) * itemsize_w
                       + (H1 + 2 * H2 + 1) * 4,
    )

    return pl.pallas_call(
        adult_mlp_kernel,
        out_shape=jax.ShapeDtypeStruct((B, N_OUT), jnp.float32),
        grid=grid,
        in_specs=in_specs,
        out_specs=out_spec,
        compiler_params=pltpu.CompilerParams(
            dimension_semantics=("parallel",),        # batch tiles shard across TCs on v7x
        ),
        cost_estimate=cost,
    )(x, w1c, b1f, w2c, b2f, w3d, b3d)


def init_params(key):
    """Deterministic PyTorch-style (uniform +-1/sqrt(fan_in)) init.

    Weights stored as (in_features, out_features) so the forward does x @ W
    (equivalent to PyTorch's x @ W.T with W of shape (out, in)).
    """
    dims = [(F_IN, H1), (H1, H2), (H2, N_OUT)]
    params = []
    for i, (fan_in, fan_out) in enumerate(dims):
        kw, kb = jax.random.split(jax.random.fold_in(key, i))
        bound = 1.0 / jnp.sqrt(fan_in)
        w = jax.random.uniform(kw, (fan_in, fan_out), jnp.float32, -bound, bound)
        b = jax.random.uniform(kb, (1, fan_out), jnp.float32, -bound, bound)
        params += [w, b]
    return tuple(params)


def reference_forward(x, params):
    """Pure-JAX reference (matches the PyTorch module's forward)."""
    w1, b1, w2, b2, w3, b3 = params
    h1 = jnp.maximum(x @ w1 + b1, 0.0)
    h2 = jnp.maximum(h1 @ w2 + b2, 0.0)
    logits = h2 @ w3 + b3
    return jax.nn.softmax(logits, axis=-1)


if __name__ == "__main__":
    key = jax.random.PRNGKey(0)
    k_x, k_p = jax.random.split(key)
    params = init_params(k_p)

    prepared_f32 = prepare_params(params, compute_dtype=jnp.float32)
    prepared_bf16 = prepare_params(params, compute_dtype=jnp.bfloat16)   # default fast path

    # --- small batch (module-spec-sized), single tile ---
    B = 8
    x = jax.random.normal(k_x, (B, F_IN), dtype=jnp.float32)
    ref = reference_forward(x, params)

    out_f32 = jax.block_until_ready(adult_model_forward(x, prepared_f32))
    assert out_f32.shape == (B, N_OUT)
    assert jnp.allclose(out_f32, ref, atol=2e-3, rtol=0.0), "f32 small-batch mismatch"
    assert jnp.allclose(jnp.sum(out_f32, axis=-1), 1.0, atol=1e-5)

    out_bf16 = jax.block_until_ready(adult_model_forward(x, prepared_bf16))
    assert out_bf16.shape == (B, N_OUT)
    assert jnp.allclose(out_bf16, ref, atol=3e-2, rtol=0.0), "bf16 small-batch mismatch"
    assert jnp.allclose(jnp.sum(out_bf16, axis=-1), 1.0, atol=1e-5)

    # --- larger, non-multiple batch: multi-tile grid + ragged (masked) last block ---
    B2 = 1037
    x2 = jax.random.normal(jax.random.fold_in(k_x, 1), (B2, F_IN), dtype=jnp.float32)
    ref2 = reference_forward(x2, params)
    out2 = jax.block_until_ready(adult_model_forward(x2, prepared_bf16))
    assert out2.shape == (B2, N_OUT)
    assert jnp.allclose(out2, ref2, atol=3e-2, rtol=0.0), "bf16 large-batch mismatch"
    assert jnp.allclose(jnp.sum(out2, axis=-1), 1.0, atol=1e-5)

    print("KERNEL_OK")
</pallas_src>

<mosaic_0001>
module attributes {stable_mosaic.version = 11 : i64} {
  func.func @adult_mlp_kernel(%arg0: i32, %arg1: memref<8x102xf32, #tpu.memory_space<vmem>>, %arg2: memref<102x64xf32, #tpu.memory_space<vmem>>, %arg3: memref<1x64xf32, #tpu.memory_space<vmem>>, %arg4: memref<64x32xf32, #tpu.memory_space<vmem>>, %arg5: memref<1x32xf32, #tpu.memory_space<vmem>>, %arg6: memref<1x32xf32, #tpu.memory_space<vmem>>, %arg7: memref<1x1xf32, #tpu.memory_space<vmem>>, %arg8: memref<8x2xf32, #tpu.memory_space<vmem>>) attributes {dimension_semantics = [#tpu.dimension_semantics<parallel>], iteration_bounds = array<i64: 1>, scalar_prefetch = 0 : i64, scratch_operands = 0 : i64, tpu.core_type = #tpu.core_type<tc>, window_params = [{transform_indices = @transform_0, window_bounds = array<i64: 8, 102>}, {pipeline_mode = #tpu.pipeline_mode<synchronous>, transform_indices = @transform_1, window_bounds = array<i64: 102, 64>}, {pipeline_mode = #tpu.pipeline_mode<synchronous>, transform_indices = @transform_2, window_bounds = array<i64: 1, 64>}, {pipeline_mode = #tpu.pipeline_mode<synchronous>, transform_indices = @transform_3, window_bounds = array<i64: 64, 32>}, {pipeline_mode = #tpu.pipeline_mode<synchronous>, transform_indices = @transform_4, window_bounds = array<i64: 1, 32>}, {pipeline_mode = #tpu.pipeline_mode<synchronous>, transform_indices = @transform_5, window_bounds = array<i64: 1, 32>}, {pipeline_mode = #tpu.pipeline_mode<synchronous>, transform_indices = @transform_6, window_bounds = array<i64: 1, 1>}, {transform_indices = @transform_7, window_bounds = array<i64: 8, 2>}]} {
    %c0 = arith.constant 0 : index
    %c0_0 = arith.constant 0 : index
    %0 = vector.load %arg1[%c0, %c0_0] : memref<8x102xf32, #tpu.memory_space<vmem>>, vector<8x102xf32>
    %c0_1 = arith.constant 0 : index
    %c0_2 = arith.constant 0 : index
    %1 = vector.load %arg2[%c0_1, %c0_2] : memref<102x64xf32, #tpu.memory_space<vmem>>, vector<102x64xf32>
    %cst = arith.constant dense<0.000000e+00> : vector<8x64xf32>
    %2 = tpu.matmul %0, %1, %cst {dimension_numbers = #tpu.dot_dimension_numbers<[1], [0], [0], [1], [0, 0, 1, 1], [], []>} : vector<8x102xf32>, vector<102x64xf32>, vector<8x64xf32> -> vector<8x64xf32>
    %c0_3 = arith.constant 0 : index
    %c0_4 = arith.constant 0 : index
    %3 = vector.load %arg3[%c0_3, %c0_4] : memref<1x64xf32, #tpu.memory_space<vmem>>, vector<1x64xf32>
    %4 = vector.broadcast %3 : vector<1x64xf32> to vector<8x64xf32>
    %5 = arith.addf %2, %4 : vector<8x64xf32>
    %cst_5 = arith.constant 0.000000e+00 : f32
    %6 = vector.broadcast %cst_5 : f32 to vector<8x64xf32>
    %7 = arith.maximumf %5, %6 : vector<8x64xf32>
    %c0_6 = arith.constant 0 : index
    %c0_7 = arith.constant 0 : index
    %8 = vector.load %arg4[%c0_6, %c0_7] : memref<64x32xf32, #tpu.memory_space<vmem>>, vector<64x32xf32>
    %cst_8 = arith.constant dense<0.000000e+00> : vector<8x32xf32>
    %9 = tpu.matmul %7, %8, %cst_8 {dimension_numbers = #tpu.dot_dimension_numbers<[1], [0], [0], [1], [0, 0, 1, 1], [], []>} : vector<8x64xf32>, vector<64x32xf32>, vector<8x32xf32> -> vector<8x32xf32>
    %c0_9 = arith.constant 0 : index
    %c0_10 = arith.constant 0 : index
    %10 = vector.load %arg5[%c0_9, %c0_10] : memref<1x32xf32, #tpu.memory_space<vmem>>, vector<1x32xf32>
    %11 = vector.broadcast %10 : vector<1x32xf32> to vector<8x32xf32>
    %12 = arith.addf %9, %11 : vector<8x32xf32>
    %cst_11 = arith.constant 0.000000e+00 : f32
    %13 = vector.broadcast %cst_11 : f32 to vector<8x32xf32>
    %14 = arith.maximumf %12, %13 : vector<8x32xf32>
    %c0_12 = arith.constant 0 : index
    %c0_13 = arith.constant 0 : index
    %15 = vector.load %arg6[%c0_12, %c0_13] : memref<1x32xf32, #tpu.memory_space<vmem>>, vector<1x32xf32>
    %16 = vector.broadcast %15 : vector<1x32xf32> to vector<8x32xf32>
    %17 = arith.mulf %14, %16 : vector<8x32xf32>
    %cst_14 = arith.constant dense<0.000000e+00> : vector<8xf32>
    %18 = vector.multi_reduction <add>, %17, %cst_14 [1] : vector<8x32xf32> to vector<8xf32>
    %19 = vector.shape_cast %18 : vector<8xf32> to vector<8x1xf32>
    %c0_15 = arith.constant 0 : index
    %c0_16 = arith.constant 0 : index
    %20 = vector.load %arg7[%c0_15, %c0_16] : memref<1x1xf32, #tpu.memory_space<vmem>>, vector<1x1xf32>
    %21 = vector.broadcast %20 : vector<1x1xf32> to vector<8x1xf32>
    %22 = arith.addf %19, %21 : vector<8x1xf32>
    %cst_17 = arith.constant 0.000000e+00 : f32
    %23 = vector.broadcast %cst_17 : f32 to vector<8x1xf32>
    %24 = arith.subf %23, %22 : vector<8x1xf32>
    %25 = math.exp %24 : vector<8x1xf32>
    %cst_18 = arith.constant 1.000000e+00 : f32
    %26 = vector.broadcast %cst_18 : f32 to vector<8x1xf32>
    %27 = arith.addf %26, %25 : vector<8x1xf32>
    %cst_19 = arith.constant 1.000000e+00 : f32
    %28 = vector.broadcast %cst_19 : f32 to vector<8x1xf32>
    %29 = arith.divf %28, %27 : vector<8x1xf32>
    %30 = vector.shape_cast %29 : vector<8x1xf32> to vector<8x1xf32>
    %31 = vector.broadcast %30 : vector<8x1xf32> to vector<8x2xf32>
    %32 = tpu.iota {dimensions = array<i32: 1>} : vector<8x2xi32>
    %c1_i32 = arith.constant 1 : i32
    %33 = vector.broadcast %c1_i32 : i32 to vector<8x2xi32>
    %34 = arith.cmpi eq, %32, %33 : vector<8x2xi32>
    %cst_20 = arith.constant 1.000000e+00 : f32
    %35 = vector.broadcast %cst_20 : f32 to vector<8x2xf32>
    %36 = arith.subf %35, %31 : vector<8x2xf32>
    %37 = arith.select %34, %31, %36 : vector<8x2xi1>, vector<8x2xf32>
    %c0_21 = arith.constant 0 : index
    %c0_22 = arith.constant 0 : index
    %38 = vector.load %arg8[%c0_21, %c0_22] : memref<8x2xf32, #tpu.memory_space<vmem>>, vector<8x2xf32>
    tpu.vector_store %arg8[%c0_21, %c0_22], %37 {strides = array<i32>} : memref<8x2xf32, #tpu.memory_space<vmem>>, vector<8x2xf32>,
    return
  }
  func.func @transform_0(%arg0: i32) -> (i32, i32) {
    %c0_i32 = arith.constant 0 : i32
    %c0_i32_0 = arith.constant 0 : i32
    return %arg0, %c0_i32 : i32, i32
  }
  func.func @transform_1(%arg0: i32) -> (i32, i32) {
    %c0_i32 = arith.constant 0 : i32
    %c0_i32_0 = arith.constant 0 : i32
    %c0_i32_1 = arith.constant 0 : i32
    return %c0_i32, %c0_i32_0 : i32, i32
  }
  func.func @transform_2(%arg0: i32) -> (i32, i32) {
    %c0_i32 = arith.constant 0 : i32
    %c0_i32_0 = arith.constant 0 : i32
    %c0_i32_1 = arith.constant 0 : i32
    return %c0_i32, %c0_i32_0 : i32, i32
  }
  func.func @transform_3(%arg0: i32) -> (i32, i32) {
    %c0_i32 = arith.constant 0 : i32
    %c0_i32_0 = arith.constant 0 : i32
    %c0_i32_1 = arith.constant 0 : i32
    return %c0_i32, %c0_i32_0 : i32, i32
  }
  func.func @transform_4(%arg0: i32) -> (i32, i32) {
    %c0_i32 = arith.constant 0 : i32
    %c0_i32_0 = arith.constant 0 : i32
    %c0_i32_1 = arith.constant 0 : i32
    return %c0_i32, %c0_i32_0 : i32, i32
  }
  func.func @transform_5(%arg0: i32) -> (i32, i32) {
    %c0_i32 = arith.constant 0 : i32
    %c0_i32_0 = arith.constant 0 : i32
    %c0_i32_1 = arith.constant 0 : i32
    return %c0_i32, %c0_i32_0 : i32, i32
  }
  func.func @transform_6(%arg0: i32) -> (i32, i32) {
    %c0_i32 = arith.constant 0 : i32
    %c0_i32_0 = arith.constant 0 : i32
    %c0_i32_1 = arith.constant 0 : i32
    return %c0_i32, %c0_i32_0 : i32, i32
  }
  func.func @transform_7(%arg0: i32) -> (i32, i32) {
    %c0_i32 = arith.constant 0 : i32
    %c0_i32_0 = arith.constant 0 : i32
    return %arg0, %c0_i32 : i32, i32
  }
}

</mosaic_0001>

<bundles_post_ra>
// kernel: tpu_custom_call.1
= control target key start
LH: loop header
LB: loop body
LE: loop exit
PB: predicated region body
PF: predicated region fallthrough
CT: control target
= control target key end

     0   :  { %vm53_vm0 = vcmask 1045504   ;;  %v346_v0 = vmov 0.0   ;;  %vm347_vm1 = vmmov 0   ;;  %vm49_vm2 = vcmask 834560   ;;  %s493_s1 = inlined_call_operand.vmem [shape: f32[102,64], index: 1, kind: input, shape index: {}]   ;;  %s494_s3 = inlined_call_operand.vmem [shape: f32[64,32], index: 3, kind: input, shape index: {}]   ;;  %s495_s0 = inlined_call_operand.vmem [shape: f32[8,102], index: 0, kind: input, shape index: {}]   ;;  %s496_s2 = inlined_call_operand.vmem [shape: f32[1,64], index: 2, kind: input, shape index: {}]   ;;  %s497_s6 = inlined_call_operand.<no memory space> [shape: f32[1,1], index: 6, kind: input, shape index: {}]   ;;  %s498_s4 = inlined_call_operand.vmem [shape: f32[1,32], index: 4, kind: input, shape index: {}]   ;;  %s499_s5 = inlined_call_operand.vmem [shape: f32[1,32], index: 5, kind: input, shape index: {}]   ;;  %s500_s7 = inlined_call_operand.vmem [shape: f32[8,2], index: 7, kind: output, shape index: {}]  }
   0x1   :  { %290 = vmatprep.subr.mxu0 %v346_v0  ;;  %v41_v1 = vld [vmem:[%s493_s1 + $0x60] sm:$0x3f]  ;;  %v40_v2 = vld [vmem:[%s493_s1 + $0x58] sm:$0xff]  ;;  %316 = vmatprep.mubr.msk.f32.mxu0 %vm347_vm1, %v346_v0  ;;  %v39_v3 = vld [vmem:[%s493_s1 + $0x50] sm:$0xff]  ;;  %vm143_vm3 = vcmask 523264   ;;  %v12_v28 = vstv %s497_s6  ;;  %vm226_vm4 = vcmask 261120   ;;  %v249_v46 = vlaneseq }
   0x2   :  { %291 = vmatpush3.msk.msra.mxu0 %vm53_vm0, %v41_v1  ;;  %319 = vmatprep.subr.mxu1 %v346_v0  ;;  %v38_v4 = vld [vmem:[%s493_s1 + $0x48] sm:$0xff]  ;;  %v135_v5 = vld [vmem:[%s494_s3 + $0x38] sm:$0xff]  ;;  %v134_v6 = vld [vmem:[%s494_s3 + $0x30] sm:$0xff]  ;;  %13 = vst [vmem:[#allocation2] sm:$0x1] %v12_v28  ;;  %v348_v37 = vmov 0  }
   0x3   :  { %292 = vmatprep.subr.mxu0 %v346_v0  ;;  %335 = vmatprep.mubr.msk.f32.mxu1 %vm347_vm1, %v346_v0  ;;  %v37_v7 = vld [vmem:[%s493_s1 + $0x40] sm:$0xff]  ;;  %v133_v8 = vld [vmem:[%s494_s3 + $0x28] sm:$0xff]  ;;  %v36_v9 = vld [vmem:[%s493_s1 + $0x38] sm:$0xff]  ;;  %v250_v47 = vand.u32 127, %v249_v46  ;;  %vm254_vm6 = vcmask 15360  }
   0x4   :  { %293 = vmatpush3.msra.mxu0 %v40_v2  ;;  %320 = vmatpush3.msra.mxu1 %v135_v5  ;;  %v132_v10 = vld [vmem:[%s494_s3 + $0x20] sm:$0xff]  ;;  %v35_v11 = vld [vmem:[%s493_s1 + $0x30] sm:$0xff]  ;;  %v131_v12 = vld [vmem:[%s494_s3 + $0x18] sm:$0xff] }
   0x5   :  { %294 = vmatprep.subr.mxu0 %v346_v0  ;;  %321 = vmatprep.subr.mxu1 %v346_v0  ;;  %v34_v13 = vld [vmem:[%s493_s1 + $0x28] sm:$0xff]  ;;  %v33_v14 = vld [vmem:[%s493_s1 + $0x20] sm:$0xff]  ;;  %v32_v15 = vld [vmem:[%s493_s1 + $0x18] sm:$0xff]  ;;  %vm251_vm5 = vcmp.eq.s32.totalorder %v250_v47, 1 }
   0x6   :  { %295 = vmatpush3.msra.mxu0 %v39_v3  ;;  %322 = vmatpush3.msra.mxu1 %v134_v6  ;;  %v31_v16 = vld [vmem:[%s493_s1 + $0x10] sm:$0xff]  ;;  %v30_v17 = vld [vmem:[%s493_s1 + $0x8] sm:$0xff]  ;;  %v29_v18 = vld [vmem:[%s493_s1] sm:$0xff] }
   0x7   :  { %296 = vmatprep.subr.mxu0 %v346_v0  ;;  %323 = vmatprep.subr.mxu1 %v346_v0  ;;  %v28_v19 = vld [vmem:[%s495_s0] sm:$0xff]  ;;  %v130_v20 = vld [vmem:[%s494_s3 + $0x10] sm:$0xff]  ;;  %v129_v21 = vld [vmem:[%s494_s3 + $0x8] sm:$0xff] }
   0x8   :  { %297 = vmatpush3.msra.mxu0 %v38_v4  ;;  %324 = vmatpush3.msra.mxu1 %v133_v8  ;;  %v128_v22 = vld [vmem:[%s494_s3] sm:$0xff] }
   0x9   :  { %298 = vmatprep.subr.mxu0 %v346_v0  ;;  %325 = vmatprep.subr.mxu1 %v346_v0  ;;  %v260_v23 = vld [vmem:[%s496_s2] ss:$0 sm:$0xff] }
   0xa   :  { %299 = vmatpush3.msra.mxu0 %v37_v7  ;;  %326 = vmatpush3.msra.mxu1 %v132_v10  ;;  %v263_v29 = vld [vmem:[%s498_s4] ss:$0 sm:$0xff] }
   0xb   :  { %300 = vmatprep.subr.mxu0 %v346_v0  ;;  %327 = vmatprep.subr.mxu1 %v346_v0  ;;  %v265_v33 = vld [vmem:[%s499_s5] ss:$0 sm:$0xff] }
   0xc   :  { %301 = vmatpush3.msra.mxu0 %v36_v9  ;;  %328 = vmatpush3.msra.mxu1 %v131_v12  ;;  %v266_v38 = vld [vmem:[#allocation2] ss:$0 sm:$0xff] }
   0xd   :  { %302 = vmatprep.subr.mxu0 %v346_v0  ;;  %329 = vmatprep.subr.mxu1 %v346_v0 }
   0xe   :  { %303 = vmatpush3.msra.mxu0 %v35_v11  ;;  %330 = vmatpush3.msra.mxu1 %v130_v20 }
   0xf   :  { %304 = vmatprep.subr.mxu0 %v346_v0  ;;  %331 = vmatprep.subr.mxu1 %v346_v0 }
  0x10   :  { %305 = vmatpush3.msra.mxu0 %v34_v13  ;;  %332 = vmatpush3.msra.mxu1 %v129_v21 }
  0x11   :  { %306 = vmatprep.subr.mxu0 %v346_v0  ;;  %333 = vmatprep.subr.mxu1 %v346_v0 }
  0x12   :  { %307 = vmatpush3.msra.mxu0 %v33_v14  ;;  %334 = vmatpush3.msra.mxu1 %v128_v22 }
  0x13   :  { %308 = vmatprep.subr.mxu0 %v346_v0  ;;  %341 = vset.pattern.permute.xlu0 %v348_v37 }
  0x14   :  { %309 = vmatpush3.msra.mxu0 %v32_v15 }
  0x15   :  { %310 = vmatprep.subr.mxu0 %v346_v0 }
  0x16   :  { %311 = vmatpush3.msra.mxu0 %v31_v16 }
  0x17   :  { %312 = vmatprep.subr.mxu0 %v346_v0 }
  0x18   :  { %313 = vmatpush3.msra.mxu0 %v30_v17 }
  0x19   :  { %314 = vmatprep.subr.mxu0 %v346_v0 }
  0x1a   :  { %315 = vmatpush3.msra.mxu0 %v29_v18 }
  0x1b   :  { %317 = vmatmul.mubr.msk.f32.vlgmr.msra.gmra.mxu0 %vm49_vm2, %v28_v19 }
  0xdb   :  { %v123_v24 = vpop.f32.mrf.mxu0 }
  0xdc   :  { %v124_v25 = vadd.f32 %v260_v23, %v123_v24 }
  0xdd   :  { %v318_v26 = vpop.f32.mrf.mxu0 }
  0xde   :  { %v127_v27 = vmax.f32 %v124_v25, 0.0 }
  0xe0   :  { %336 = vmatmul.mubr.msk.f32.vlgmr.msra.gmra.mxu1 %vm143_vm3, %v127_v27 }
 0x1a0   :  { %v213_v30 = vpop.f32.mrf.mxu1 }
 0x1a1   :  { %v214_v31 = vadd.f32 %v263_v29, %v213_v30 }
 0x1a2   :  { %v337_v32 = vpop.f32.mrf.mxu1 }
 0x1a3   :  { %v217_v34 = vmax.f32 %v214_v31, 0.0 }
 0x1a5   :  { %v225_v35 = vmul.f32 %v265_v33, %v217_v34 }
 0x1a7   :  { %v227_v36 = vsel %vm226_vm4, %v225_v35, 0.0 }
 0x1a8   :  { %228 = vadd.xlane.f32.xlu0 %v227_v36 }
 0x231   :  { %v229_v39 = vpop.xlane.xlu0 %228 }
 0x232   :  { %v237_v40 = vadd.f32 %v266_v38, %v229_v39 }
 0x234   :  { %v238_v41 = vsub.f32 0.0, %v237_v40 }
 0x236   :  { %v239_v42 = vmul.f32 1.442695, %v238_v41 }
 0x238   :  { %342 = vpow2.f32 %v239_v42 }
 0x245   :  { %v343_v43 = vpop.eup %342 }
 0x246   :  { %v241_v44 = vadd.f32 1.0, %v343_v43 }
 0x248   :  { %344 = vrcp.f32 %v241_v44 }
 0x255   :  { %v345_v45 = vpop.eup %344 }
 0x256   :  { %246 = vperm.xlu0 %341, %v345_v45  }
 0x2d1   :  { %v247_v48 = vpop.permute.xlu0 %246 }
 0x2d2   :  { %v252_v49 = vsub.f32 1.0, %v247_v48 }
 0x2d4   :  { %v253_v50 = vsel %vm251_vm5, %v247_v48, %v252_v49 }
 0x2d5   :  { %255 = vst.msk [vmem:[%s500_s7] sm:$0xff] %vm254_vm6, %v253_v50 }

</bundles_post_ra>
